<compile_context>
chip_gen: v7x
topology: tpu7x:2x2x1
jax: 0.10.0
libtpu: 0.0.40
codegen_flags: <defaults>
</compile_context>

<pallas_src>
import functools

import jax
import jax.numpy as jnp
from jax.experimental import pallas as pl
from jax.experimental.pallas import tpu as pltpu


def _round_up(x: int, m: int) -> int:
    return ((x + m - 1) // m) * m


# ---------------------------------------------------------------------------
# Kernels
# ---------------------------------------------------------------------------
def _rb_kernel(x_ref, w_ref, o_ref, acc_ref, *, apply_relu: bool):
    """No-bias variant. x_ref:(tm,tk)  w_ref:(tk,tn)  o_ref:(tm,tn)  acc:(tm,tn) f32."""
    k = pl.program_id(2)

    @pl.when(k == 0)
    def _():
        acc_ref[...] = jnp.zeros_like(acc_ref)

    acc_ref[...] += jnp.dot(x_ref[...], w_ref[...],
                            preferred_element_type=jnp.float32)

    @pl.when(k == pl.num_programs(2) - 1)
    def _():
        out = acc_ref[...]
        if apply_relu:
            out = jnp.maximum(out, 0.0)
        o_ref[...] = out.astype(o_ref.dtype)


def _rb_kernel_bias(x_ref, w_ref, b_ref, o_ref, acc_ref, *, apply_relu: bool):
    """Bias variant. b_ref:(1,tn); bias is fused into the k==last finalize only."""
    k = pl.program_id(2)

    @pl.when(k == 0)
    def _():
        acc_ref[...] = jnp.zeros_like(acc_ref)

    acc_ref[...] += jnp.dot(x_ref[...], w_ref[...],
                            preferred_element_type=jnp.float32)

    @pl.when(k == pl.num_programs(2) - 1)
    def _():
        out = acc_ref[...] + b_ref[...].astype(jnp.float32)   # broadcast (1,tn)
        if apply_relu:
            out = jnp.maximum(out, 0.0)
        o_ref[...] = out.astype(o_ref.dtype)


# ---------------------------------------------------------------------------
# Wrapper
# ---------------------------------------------------------------------------
def random_buffer_forward(x, weight, bias=None, *, activation="relu",
                          tm=256, tn=256, tk=512):
    """activation(x @ weight.T + bias). Matches RandomBuffer.forward (X = X.to(weight))."""
    out_dtype = weight.dtype
    x = x.astype(out_dtype)

    # torch.nn.Linear accepts arbitrary leading dims; flatten them to a batch.
    lead_shape = x.shape[:-1]
    K = x.shape[-1]
    x2d = x.reshape(-1, K)
    M = x2d.shape[0]
    N = weight.shape[0]
    apply_relu = activation == "relu"

    # One-time transpose of the frozen weight: (out,in) -> (in,out) = (K, N).
    w_t = jnp.asarray(weight).T

    # Tile sizes: sublane axis multiple of 8, lane/contraction axes multiple of 128,
    # never larger than the padded problem dims.
    tm = min(tm, _round_up(M, 8))
    tn = min(tn, _round_up(N, 128))
    tk = min(tk, _round_up(K, 128))

    Mp, Np, Kp = _round_up(M, tm), _round_up(N, tn), _round_up(K, tk)
    if (Mp, Kp) != (M, K):
        x2d = jnp.pad(x2d, ((0, Mp - M), (0, Kp - K)))
    if (Kp, Np) != (K, N):
        w_t = jnp.pad(w_t, ((0, Kp - K), (0, Np - N)))

    has_bias = bias is not None
    if has_bias:
        b2d = jnp.asarray(bias).astype(out_dtype).reshape(1, N)
        if Np != N:
            b2d = jnp.pad(b2d, ((0, 0), (0, Np - N)))

    grid = (Mp // tm, Np // tn, Kp // tk)

    x_spec = pl.BlockSpec((tm, tk), lambda i, j, k: (i, k))
    w_spec = pl.BlockSpec((tk, tn), lambda i, j, k: (k, j))
    b_spec = pl.BlockSpec((1, tn), lambda i, j, k: (0, j))
    o_spec = pl.BlockSpec((tm, tn), lambda i, j, k: (i, j))

    itemsize = jnp.dtype(out_dtype).itemsize
    bytes_accessed = (Mp * Kp + Kp * Np + Mp * Np) * itemsize \
        + (Np * itemsize if has_bias else 0)
    cost = pl.CostEstimate(flops=2 * Mp * Np * Kp, transcendentals=0,
                           bytes_accessed=bytes_accessed)

    if has_bias:
        kernel = functools.partial(_rb_kernel_bias, apply_relu=apply_relu)
        in_specs = [x_spec, w_spec, b_spec]
        operands = (x2d, w_t, b2d)
    else:
        kernel = functools.partial(_rb_kernel, apply_relu=apply_relu)
        in_specs = [x_spec, w_spec]
        operands = (x2d, w_t)

    out_padded = pl.pallas_call(
        kernel,
        out_shape=jax.ShapeDtypeStruct((Mp, Np), out_dtype),
        grid_spec=pltpu.PrefetchScalarGridSpec(
            num_scalar_prefetch=0,
            grid=grid,
            in_specs=in_specs,
            out_specs=o_spec,
            scratch_shapes=[pltpu.VMEM((tm, tn), jnp.float32)],
        ),
        compiler_params=pltpu.CompilerParams(
            dimension_semantics=("parallel", "parallel", "arbitrary"),
        ),
        cost_estimate=cost,
    )(*operands)

    out = out_padded[:M, :N]
    return out.reshape(*lead_shape, N)


# ---------------------------------------------------------------------------
# Self-test
# ---------------------------------------------------------------------------
if __name__ == "__main__":
    # Shapes consistent with a small Linear buffer: batch=8, in_features=32, out_features=64
    batch, in_features, out_features = 8, 32, 64

    key = jax.random.PRNGKey(0)
    kx, kw, kb = jax.random.split(key, 3)

    # Deterministic "frozen random" parameters (kaiming-uniform-ish scale).
    bound = 1.0 / (in_features ** 0.5)
    weight = jax.random.uniform(kw, (out_features, in_features),
                                minval=-bound, maxval=bound, dtype=jnp.float32)
    bias = jax.random.uniform(kb, (out_features,), minval=-bound, maxval=bound,
                              dtype=jnp.float32)
    x = jax.random.normal(kx, (batch, in_features), dtype=jnp.float32)

    # --- default RandomBuffer: bias=False, activation=ReLU ---
    out_nobias = jax.block_until_ready(random_buffer_forward(x, weight, None))
    ref_nobias = jnp.maximum(x @ weight.T, 0.0)
    assert out_nobias.shape == (batch, out_features)
    assert jnp.allclose(out_nobias, ref_nobias, atol=1e-5, rtol=1e-5), \
        "no-bias mismatch vs reference"

    # --- bias=True variant ---
    out_bias = jax.block_until_ready(random_buffer_forward(x, weight, bias))
    ref_bias = jnp.maximum(x @ weight.T + bias, 0.0)
    assert jnp.allclose(out_bias, ref_bias, atol=1e-5, rtol=1e-5), \
        "bias mismatch vs reference"

    # --- activation=None (Identity) variant ---
    out_id = jax.block_until_ready(
        random_buffer_forward(x, weight, bias, activation=None))
    ref_id = x @ weight.T + bias
    assert jnp.allclose(out_id, ref_id, atol=1e-5, rtol=1e-5), \
        "identity-activation mismatch vs reference"

    print("KERNEL_OK")
</pallas_src>

<mosaic_0001>
module attributes {stable_mosaic.version = 11 : i64} {
  func.func @_rb_kernel(%arg0: i32, %arg1: i32, %arg2: i32, %arg3: memref<8x128xf32, #tpu.memory_space<vmem>>, %arg4: memref<128x128xf32, #tpu.memory_space<vmem>>, %arg5: memref<8x128xf32, #tpu.memory_space<vmem>>, %arg6: memref<8x128xf32, #tpu.memory_space<vmem>>) attributes {dimension_semantics = [#tpu.dimension_semantics<parallel>, #tpu.dimension_semantics<parallel>, #tpu.dimension_semantics<arbitrary>], iteration_bounds = array<i64: 1, 1, 1>, scalar_prefetch = 0 : i64, scratch_operands = 1 : i64, tpu.core_type = #tpu.core_type<tc>, window_params = [{transform_indices = @transform_0, window_bounds = array<i64: 8, 128>}, {transform_indices = @transform_1, window_bounds = array<i64: 128, 128>}, {transform_indices = @transform_2, window_bounds = array<i64: 8, 128>}]} {
    %c0_i32 = arith.constant 0 : i32
    %0 = arith.cmpi eq, %arg2, %c0_i32 : i32
    %1 = arith.extui %0 : i1 to i32
    %c0_i32_0 = arith.constant 0 : i32
    %2 = arith.cmpi ne, %1, %c0_i32_0 : i32
    scf.if %2 {
      %cst_10 = arith.constant 0.000000e+00 : f32
      %12 = vector.broadcast %cst_10 : f32 to vector<8x128xf32>
      %c0_11 = arith.constant 0 : index
      %c0_12 = arith.constant 0 : index
      %13 = vector.load %arg6[%c0_11, %c0_12] : memref<8x128xf32, #tpu.memory_space<vmem>>, vector<8x128xf32>
      tpu.vector_store %arg6[%c0_11, %c0_12], %12 {strides = array<i32>} : memref<8x128xf32, #tpu.memory_space<vmem>>, vector<8x128xf32>,
    } else {
    }
    %c0 = arith.constant 0 : index
    %c0_1 = arith.constant 0 : index
    %3 = vector.load %arg6[%c0, %c0_1] : memref<8x128xf32, #tpu.memory_space<vmem>>, vector<8x128xf32>
    %c0_2 = arith.constant 0 : index
    %c0_3 = arith.constant 0 : index
    %4 = vector.load %arg3[%c0_2, %c0_3] : memref<8x128xf32, #tpu.memory_space<vmem>>, vector<8x128xf32>
    %c0_4 = arith.constant 0 : index
    %c0_5 = arith.constant 0 : index
    %5 = vector.load %arg4[%c0_4, %c0_5] : memref<128x128xf32, #tpu.memory_space<vmem>>, vector<128x128xf32>
    %cst = arith.constant dense<0.000000e+00> : vector<8x128xf32>
    %6 = tpu.matmul %4, %5, %cst {dimension_numbers = #tpu.dot_dimension_numbers<[1], [0], [0], [1], [0, 0, 1, 1], [], []>} : vector<8x128xf32>, vector<128x128xf32>, vector<8x128xf32> -> vector<8x128xf32>
    %7 = arith.addf %3, %6 : vector<8x128xf32>
    %c0_6 = arith.constant 0 : index
    %c0_7 = arith.constant 0 : index
    %8 = vector.load %arg6[%c0_6, %c0_7] : memref<8x128xf32, #tpu.memory_space<vmem>>, vector<8x128xf32>
    tpu.vector_store %arg6[%c0_6, %c0_7], %7 {strides = array<i32>} : memref<8x128xf32, #tpu.memory_space<vmem>>, vector<8x128xf32>,
    %c0_i32_8 = arith.constant 0 : i32
    %9 = arith.cmpi eq, %arg2, %c0_i32_8 : i32
    %10 = arith.extui %9 : i1 to i32
    %c0_i32_9 = arith.constant 0 : i32
    %11 = arith.cmpi ne, %10, %c0_i32_9 : i32
    scf.if %11 {
      %c0_10 = arith.constant 0 : index
      %c0_11 = arith.constant 0 : index
      %12 = vector.load %arg6[%c0_10, %c0_11] : memref<8x128xf32, #tpu.memory_space<vmem>>, vector<8x128xf32>
      %cst_12 = arith.constant 0.000000e+00 : f32
      %13 = vector.broadcast %cst_12 : f32 to vector<8x128xf32>
      %14 = arith.maximumf %12, %13 : vector<8x128xf32>
      %c0_13 = arith.constant 0 : index
      %c0_14 = arith.constant 0 : index
      %15 = vector.load %arg5[%c0_13, %c0_14] : memref<8x128xf32, #tpu.memory_space<vmem>>, vector<8x128xf32>
      tpu.vector_store %arg5[%c0_13, %c0_14], %14 {strides = array<i32>} : memref<8x128xf32, #tpu.memory_space<vmem>>, vector<8x128xf32>,
    } else {
    }
    return
  }
  func.func @transform_0(%arg0: i32, %arg1: i32, %arg2: i32) -> (i32, i32) {
    %c0_i32 = arith.constant 0 : i32
    return %arg0, %arg2 : i32, i32
  }
  func.func @transform_1(%arg0: i32, %arg1: i32, %arg2: i32) -> (i32, i32) {
    %c0_i32 = arith.constant 0 : i32
    return %arg2, %arg1 : i32, i32
  }
  func.func @transform_2(%arg0: i32, %arg1: i32, %arg2: i32) -> (i32, i32) {
    %c0_i32 = arith.constant 0 : i32
    return %arg0, %arg1 : i32, i32
  }
}

</mosaic_0001>

<bundles_post_ra>
// kernel: tpu_custom_call.1
= control target key start
LH: loop header
LB: loop body
LE: loop exit
PB: predicated region body
PF: predicated region fallthrough
CT: control target
= control target key end

     0   :  { %7 = vsyncpa [#allocation4], 0  ;;  %s377_s0 = inlined_call_operand.hbm [shape: f32[8,128], index: 0, kind: input, shape index: {}]   ;;  %s378_s1 = inlined_call_operand.hbm [shape: f32[128,128], index: 1, kind: input, shape index: {}]   ;;  %s379_s2 = inlined_call_operand.hbm [shape: f32[8,128], index: 2, kind: output, shape index: {}]  }
   0x1   :  { %8 = vsyncpa [#allocation7], 0 }
   0x2   :  { %9 = vsyncpa [#allocation5], 0  ;;  %s311_s9 = smov [#allocation3]   ;;  %s312_s11 = smov [#allocation6]  }
   0x3   :  { %s16_s10 = sshll.u32 %s311_s9, 4  ;;  %s25_s12 = sshll.u32 %s312_s11, 4  ;;  %s17_s10 = int_to_ptr.vmem [resolvable:$true] %s16_s10  ;;  %s334_s12 = int_to_ptr.vmem [resolvable:$true] %s25_s12 }
   0x4   :  { %s239_s15 = scalar_lea.hbm %s377_s0, 128 }
   0x5   :  { %p240_p0 = scmp.ne.s32.totalorder %s377_s0, %s239_s15  ;;  %p243_p1 = scmp.lt.u32.totalorder %s239_s15, %s377_s0 }
   0x7   :  { %p245_p2 = pnand %p243_p1, %p240_p0 }
   0x9   :  { %248 = shalt.err (!%p245_p2)
}
   0xa   :  { %s249_s20 = scalar_lea.vmem %s17_s10, 128  ;;  %p254_p4 = scmp.lt.s32.totalorder %s17_s10, %s17_s10 }
   0xb   :  { %p250_p3 = scmp.ne.s32.totalorder %s17_s10, %s249_s20  ;;  %p255_p5 = scmp.lt.s32.totalorder %s249_s20, %s249_s20 }
   0xd   :  { %p256_p6 = por %p255_p5, %p254_p4 }
   0xf   :  { %p257_p7 = pnand %p256_p6, %p250_p3 }
  0x11   :  { %260 = shalt.err (!%p257_p7)
}
  0x12   :  { %19 = dma.hbm_to_vmem [thread:$0]  %s377_s0, 128, %s17_s10, [#allocation4]  }
  0x13   :  { %s261_s25 = scalar_lea.hbm %s378_s1, 2048 }
  0x14   :  { %p262_p8 = scmp.ne.s32.totalorder %s378_s1, %s261_s25  ;;  %p265_p9 = scmp.lt.u32.totalorder %s261_s25, %s378_s1 }
  0x16   :  { %p267_p10 = pnand %p265_p9, %p262_p8 }
  0x18   :  { %270 = shalt.err (!%p267_p10)
}
  0x19   :  { %s271_s30 = scalar_lea.vmem %s334_s12, 2048  ;;  %p276_p12 = scmp.lt.s32.totalorder %s334_s12, %s334_s12 }
  0x1a   :  { %p272_p11 = scmp.ne.s32.totalorder %s334_s12, %s271_s30  ;;  %p277_p13 = scmp.lt.s32.totalorder %s271_s30, %s271_s30 }
  0x1c   :  { %p278_p0 = por %p277_p13, %p276_p12 }
  0x1e   :  { %p279_p1 = pnand %p278_p0, %p272_p11 }
  0x20   :  { %282 = shalt.err (!%p279_p1)
}
  0x21   :  { %s313_s0 = smov 128   ;;  %s314_s3 = smov 8  }
  0x22   :  { %31 = dma.hbm_to_vmem [thread:$0]  %s378_s1, 2048, %s334_s12, [#allocation7], %s313_s0, %s313_s0, %s314_s3  }
  0x23   :  { %305 = dma.done.wait [#allocation4], 128  }
  0x24   :  { %306 = vsyncadd [#allocation4], 4294967168 }
  0x25   :  { %307 = dma.done.wait [#allocation7], 2048  }
  0x26   :  { %308 = vsyncadd [#allocation7], 4294965248  ;;  %v315_v0 = vmov 0.0|0.0   ;;  %vm316_vm0 = vmmov 0   ;;  %v317_v1 = vmov 0.0   ;;  %v45_v2 = vld [vmem:[#allocation6] sm:$0xff] }
  0x27   :  { %207 = vmatprep.subr.bf16.mxu0 %v315_v0  ;;  %204 = vmatprep.mubr.msk.f32.mxu0 %vm316_vm0, %v317_v1  ;;  %v46_v3 = vld [vmem:[#allocation6 + $0x8] sm:$0xff]  ;;  %v47_v4 = vld [vmem:[#allocation6 + $0x10] sm:$0xff]  ;;  %v48_v6 = vld [vmem:[#allocation6 + $0x18] sm:$0xff]  ;;  %s318_s1 = smov [#allocation8]  }
  0x28   :  { %v208_v5 = vpack.c.bf16 %v46_v3, %v45_v2  ;;  %v211_v7 = vpack.c.bf16 %v48_v6, %v47_v4  ;;  %v49_v8 = vld [vmem:[#allocation6 + $0x20] sm:$0xff]  ;;  %v50_v9 = vld [vmem:[#allocation6 + $0x28] sm:$0xff]  ;;  %v51_v11 = vld [vmem:[#allocation6 + $0x30] sm:$0xff]  ;;  %s145_s6 = sshll.u32 %s318_s1, 4  ;;  %s146_s6 = int_to_ptr.vmem [resolvable:$true] %s145_s6 }
  0x29   :  { %v214_v10 = vpack.c.bf16 %v50_v9, %v49_v8  ;;  %v52_v12 = vld [vmem:[#allocation6 + $0x38] sm:$0xff]  ;;  %v53_v14 = vld [vmem:[#allocation6 + $0x40] sm:$0xff]  ;;  %v54_v15 = vld [vmem:[#allocation6 + $0x48] sm:$0xff]  ;;  %s283_s7 = scalar_lea.vmem %s146_s6, 128  ;;  %p288_p3 = scmp.lt.s32.totalorder %s146_s6, %s146_s6 }
  0x2a   :  { %209 = vmatpush3.bf16.msra.mxu0 %v208_v5  ;;  %v217_v13 = vpack.c.bf16 %v52_v12, %v51_v11  ;;  %v220_v16 = vpack.c.bf16 %v54_v15, %v53_v14  ;;  %v55_v17 = vld [vmem:[#allocation6 + $0x50] sm:$0xff]  ;;  %v56_v18 = vld [vmem:[#allocation6 + $0x58] sm:$0xff]  ;;  %v57_v20 = vld [vmem:[#allocation6 + $0x60] sm:$0xff]  ;;  %p284_p2 = scmp.ne.s32.totalorder %s146_s6, %s283_s7  ;;  %p289_p4 = scmp.lt.s32.totalorder %s283_s7, %s283_s7 }
  0x2b   :  { %210 = vmatprep.subr.bf16.mxu0 %v315_v0  ;;  %v223_v19 = vpack.c.bf16 %v56_v18, %v55_v17  ;;  %v58_v21 = vld [vmem:[#allocation6 + $0x68] sm:$0xff]  ;;  %v59_v23 = vld [vmem:[#allocation6 + $0x70] sm:$0xff]  ;;  %v60_v24 = vld [vmem:[#allocation6 + $0x78] sm:$0xff] }
  0x2c   :  { %v226_v22 = vpack.c.bf16 %v58_v21, %v57_v20  ;;  %v229_v25 = vpack.c.bf16 %v60_v24, %v59_v23  ;;  %v44_v26 = vld [vmem:[#allocation3] sm:$0xff]  ;;  %p290_p5 = por %p289_p4, %p288_p3 }
  0x2e   :  { %212 = vmatpush3.bf16.msra.mxu0 %v211_v7  ;;  %p291_p6 = pnand %p290_p5, %p284_p2 }
  0x2f   :  { %213 = vmatprep.subr.bf16.mxu0 %v315_v0 }
  0x32   :  { %215 = vmatpush3.bf16.msra.mxu0 %v214_v10 }
  0x33   :  { %216 = vmatprep.subr.bf16.mxu0 %v315_v0 }
  0x36   :  { %218 = vmatpush3.bf16.msra.mxu0 %v217_v13 }
  0x37   :  { %219 = vmatprep.subr.bf16.mxu0 %v315_v0 }
  0x3a   :  { %221 = vmatpush3.bf16.msra.mxu0 %v220_v16 }
  0x3b   :  { %222 = vmatprep.subr.bf16.mxu0 %v315_v0 }
  0x3e   :  { %224 = vmatpush3.bf16.msra.mxu0 %v223_v19 }
  0x3f   :  { %225 = vmatprep.subr.bf16.mxu0 %v315_v0 }
  0x42   :  { %227 = vmatpush3.bf16.msra.mxu0 %v226_v22 }
  0x43   :  { %228 = vmatprep.subr.bf16.mxu0 %v315_v0 }
  0x46   :  { %230 = vmatpush3.bf16.msra.mxu0 %v229_v25 }
  0x49   :  { %205 = vmatmul.mubr.f32.vlgmr.msra.gmra.mrb[0].mxu0 %v44_v26 }
 0x11c   :  { %v127_v27 = vpop.f32.mrb[0].mxu0 }
 0x11d   :  { %v137_v28 = vmax.f32 %v127_v27, 0.0  ;;  %v206_v29 = vpop.f32.mrb[1].mxu0 }
 0x11f   :  { %138 = vst [vmem:[#allocation8] sm:$0xff] %v137_v28 }
 0x120   :  { %294 = shalt.err (!%p291_p6)
}
 0x121   :  { %s295_s10 = scalar_lea.hbm %s379_s2, 128 }
 0x122   :  { %p296_p7 = scmp.ne.s32.totalorder %s379_s2, %s295_s10  ;;  %p299_p8 = scmp.lt.u32.totalorder %s295_s10, %s379_s2 }
 0x124   :  { %p301_p9 = pnand %p299_p8, %p296_p7 }
 0x126   :  { %304 = shalt.err (!%p301_p9)
}
 0x127   :  { %148 = dma.vmem_to_hbm [thread:$0]  %s146_s6, 128, %s379_s2, [#allocation5]  }
 0x128   :  { %309 = dma.done.wait [#allocation5], 128  }
 0x129   :  { %310 = vsyncadd [#allocation5], 4294967168 }
 0x12a   :  { %152 = vsyncpa [#allocation4], 1 }
 0x12b   :  { %153 = vsyncpa [#allocation7], 1 }
 0x12c   :  { %154 = vsyncpa [#allocation5], 1 }

</bundles_post_ra>
